<compile_context>
chip_gen: v7x
topology: tpu7x:2x2x1
jax: 0.10.0
libtpu: 0.0.40
codegen_flags: <defaults>
</compile_context>

<pallas_src>
from functools import partial

import jax
import jax.numpy as jnp
from jax.experimental import pallas as pl
from jax.experimental.pallas import tpu as pltpu


def _linear_hardsigmoid_kernel(x_ref, wb_ref, o_ref, *, in_features):
    # x_ref : (B, IN)          activations
    # wb_ref: (IN + 8, OUT)    packed params: rows [0,IN) = W^T, row IN = bias + 3
    # o_ref : (B, OUT)
    w = wb_ref[:in_features, :]                        # (IN, OUT)  standard (K, N) operand
    b3 = wb_ref[in_features:in_features + 1, :]        # (1, OUT)   bias + 3 (prep-time fold)

    acc = jnp.dot(x_ref[...], w, preferred_element_type=jnp.float32)  # (B, OUT) on MXU
    l = acc + b3                                       # broadcast over batch rows
    l = jnp.maximum(l, 0.0)                            # clamp_min(_, 0)
    l = jnp.minimum(l, 6.0)                            # clamp_max(_, 6)
    o_ref[...] = (l * (1.0 / 6.0)).astype(o_ref.dtype)  # constant multiply (== /6 within ~1 ulp)


def prepare_params(weight, bias):
    """Pack (OUT, IN) weight and (OUT,) bias into one (IN + 8, OUT) slab.

    Rows [0, IN)  : weight transposed to (IN, OUT)  -> standard MXU contraction
    Row  IN       : bias + 3.0                       -> '+3' folded at prep time
    Rows IN+1 ... : zero padding (keeps sublane count a multiple of 8)
    """
    out_features, in_features = weight.shape
    rows = in_features + 8
    wb = jnp.zeros((rows, out_features), dtype=jnp.float32)
    wb = wb.at[:in_features, :].set(weight.T.astype(jnp.float32))
    wb = wb.at[in_features, :].set(bias.astype(jnp.float32) + 3.0)
    return wb


def linear_hardsigmoid(x, wb, in_features):
    """x: (B, IN) f32, wb: packed (IN+8, OUT) f32 -> (B, OUT) f32."""
    B = x.shape[0]
    out_features = wb.shape[1]

    vmem = pl.BlockSpec(memory_space=pltpu.MemorySpace.VMEM)
    cost = pl.CostEstimate(
        flops=2 * B * in_features * out_features,
        bytes_accessed=4 * (B * in_features + wb.size + B * out_features),
        transcendentals=0,
    )
    return pl.pallas_call(
        partial(_linear_hardsigmoid_kernel, in_features=in_features),
        out_shape=jax.ShapeDtypeStruct((B, out_features), jnp.float32),
        in_specs=[vmem, vmem],
        out_specs=vmem,
        cost_estimate=cost,
    )(x, wb)


if __name__ == "__main__":
    key = jax.random.PRNGKey(0)
    kx, kw, kb = jax.random.split(key, 3)

    # Shapes implied by the module: x1 (1, 32), weight (8, 32), bias (8,)
    IN, OUT = 32, 8
    x1 = jax.random.normal(kx, (1, IN), dtype=jnp.float32)
    weight = jax.random.normal(kw, (OUT, IN), dtype=jnp.float32)
    bias = jax.random.normal(kb, (OUT,), dtype=jnp.float32)

    wb = prepare_params(weight, bias)        # parameter-prep time (done once)
    out = linear_hardsigmoid(x1, wb, IN)
    out = jax.block_until_ready(out)

    # Reference check in plain JAX (matches the PyTorch forward)
    ref = jnp.clip(x1 @ weight.T + bias + 3.0, 0.0, 6.0) / 6.0
    assert out.shape == (1, OUT)
    assert jnp.allclose(out, ref, atol=1e-5, rtol=1e-5)

    print("KERNEL_OK")
</pallas_src>

<mosaic_0001>
module attributes {stable_mosaic.version = 11 : i64} {
  func.func @_linear_hardsigmoid_kernel(%arg0: memref<1x32xf32, #tpu.memory_space<vmem>>, %arg1: memref<40x8xf32, #tpu.memory_space<vmem>>, %arg2: memref<1x8xf32, #tpu.memory_space<vmem>>) attributes {dimension_semantics = [], scalar_prefetch = 0 : i64, scratch_operands = 0 : i64, tpu.core_type = #tpu.core_type<tc>} {
    %c0 = arith.constant 0 : index
    %c0_0 = arith.constant 0 : index
    %0 = vector.load %arg1[%c0, %c0_0] : memref<40x8xf32, #tpu.memory_space<vmem>>, vector<32x8xf32>
    %c32 = arith.constant 32 : index
    %c0_1 = arith.constant 0 : index
    %1 = vector.load %arg1[%c32, %c0_1] : memref<40x8xf32, #tpu.memory_space<vmem>>, vector<1x8xf32>
    %c0_2 = arith.constant 0 : index
    %c0_3 = arith.constant 0 : index
    %2 = vector.load %arg0[%c0_2, %c0_3] : memref<1x32xf32, #tpu.memory_space<vmem>>, vector<1x32xf32>
    %cst = arith.constant dense<0.000000e+00> : vector<1x8xf32>
    %3 = tpu.matmul %2, %0, %cst {dimension_numbers = #tpu.dot_dimension_numbers<[1], [0], [0], [1], [0, 0, 1, 1], [], []>} : vector<1x32xf32>, vector<32x8xf32>, vector<1x8xf32> -> vector<1x8xf32>
    %4 = arith.addf %3, %1 : vector<1x8xf32>
    %cst_4 = arith.constant 0.000000e+00 : f32
    %5 = vector.broadcast %cst_4 : f32 to vector<1x8xf32>
    %6 = arith.maximumf %4, %5 : vector<1x8xf32>
    %cst_5 = arith.constant 6.000000e+00 : f32
    %7 = vector.broadcast %cst_5 : f32 to vector<1x8xf32>
    %8 = arith.minimumf %6, %7 : vector<1x8xf32>
    %cst_6 = arith.constant 0.166666672 : f32
    %9 = vector.broadcast %cst_6 : f32 to vector<1x8xf32>
    %10 = arith.mulf %8, %9 : vector<1x8xf32>
    %c0_7 = arith.constant 0 : index
    %c0_8 = arith.constant 0 : index
    %11 = vector.load %arg2[%c0_7, %c0_8] : memref<1x8xf32, #tpu.memory_space<vmem>>, vector<1x8xf32>
    tpu.vector_store %arg2[%c0_7, %c0_8], %10 {strides = array<i32>} : memref<1x8xf32, #tpu.memory_space<vmem>>, vector<1x8xf32>,
    return
  }
}

</mosaic_0001>

<bundles_post_ra>
// kernel: tpu_custom_call.1
= control target key start
LH: loop header
LB: loop body
LE: loop exit
PB: predicated region body
PF: predicated region fallthrough
CT: control target
= control target key end

     0   :  { %v162_v3 = vmov 0.0|0.0   ;;  %vm163_vm0 = vmmov 0   ;;  %v164_v6 = vmov 0.0   ;;  %s211_s0 = inlined_call_operand.vmem [shape: f32[1,32], index: 0, kind: input, shape index: {}]   ;;  %s212_s1 = inlined_call_operand.vmem [shape: f32[40,8], index: 1, kind: input, shape index: {}]   ;;  %s213_s2 = inlined_call_operand.hbm [shape: f32[1,8], index: 2, kind: output, shape index: {}]  }
   0x1   :  { %v12_v0 = vld [vmem:[%s212_s1] sm:$0xff]  ;;  %v13_v1 = vld [vmem:[%s212_s1 + $0x8] sm:$0xff]  ;;  %v14_v2 = vld [vmem:[%s212_s1 + $0x10] sm:$0xff]  ;;  %128 = vmatprep.subr.bf16.mxu0 %v162_v3  ;;  %125 = vmatprep.mubr.msk.f32.mxu0 %vm163_vm0, %v164_v6 }
   0x2   :  { %v129_v4 = vpack.c.bf16 %v13_v1, %v12_v0  ;;  %v15_v5 = vld [vmem:[%s212_s1 + $0x18] sm:$0xff] }
   0x3   :  { %7 = vsyncpa [#allocation3], 0  ;;  %v132_v7 = vpack.c.bf16 %v15_v5, %v14_v2  ;;  %v17_v8 = vld [vmem:[%s211_s0] sm:$0x1]  ;;  %vm18_vm1 = vcmask 261120   ;;  %s165_s21 = smov [#allocation2]  }
   0x4   :  { %130 = vmatpush3.bf16.msra.mxu0 %v129_v4  ;;  %v16_v9 = vld [vmem:[%s212_s1 + $0x20] sm:$0x1]  ;;  %s103_s22 = sshll.u32 %s165_s21, 4  ;;  %vm95_vm2 = vcmask 57344   ;;  %s104_s22 = int_to_ptr.vmem [resolvable:$true] %s103_s22 }
   0x5   :  { %131 = vmatprep.subr.bf16.mxu0 %v162_v3  ;;  %s138_s23 = scalar_lea.vmem %s104_s22, 16  ;;  %s142_s0 = scalar_lea.vmem %s104_s22, 32 }
   0x6   :  { %p139_p0 = scmp.ne.s32.totalorder %s104_s22, %s138_s23  ;;  %p143_p1 = scmp.lt.s32.totalorder %s104_s22, %s104_s22 }
   0x7   :  { %p144_p2 = scmp.lt.s32.totalorder %s142_s0, %s138_s23 }
   0x8   :  { %133 = vmatpush3.bf16.msra.mxu0 %v132_v7 }
   0x9   :  { %p145_p3 = por %p144_p2, %p143_p1 }
   0xb   :  { %126 = vmatmul.mubr.msk.f32.vlgmr.msra.gmra.mrb[0].mxu0 %vm18_vm1, %v17_v8  ;;  %p146_p4 = pnand %p145_p3, %p139_p0 }
  0xde   :  { %v88_v10 = vpop.f32.mrb[0].mxu0 }
  0xdf   :  { %v89_v11 = vadd.f32 %v88_v10, %v16_v9  ;;  %v127_v12 = vpop.f32.mrb[1].mxu0 }
  0xe1   :  { %v92_v13 = vmax.f32 %v89_v11, 0.0 }
  0xe3   :  { %v93_v14 = vmin.f32 %v92_v13, 6.0 }
  0xe5   :  { %v94_v15 = vmul.f32 0.16666667, %v93_v14 }
  0xe7   :  { %96 = vst.msk [vmem:[#allocation2] sm:$0x1] %vm95_vm2, %v94_v15 }
  0xe8   :  { %149 = shalt.err (!%p146_p4)
}
  0xe9   :  { %s150_s25 = scalar_lea.hbm %s213_s2, 16 }
  0xea   :  { %p151_p5 = scmp.ne.s32.totalorder %s213_s2, %s150_s25  ;;  %p154_p6 = scmp.lt.u32.totalorder %s150_s25, %s213_s2 }
  0xec   :  { %p156_p7 = pnand %p154_p6, %p151_p5 }
  0xee   :  { %159 = shalt.err (!%p156_p7)
}
  0xef   :  { %106 = dma.vmem_to_hbm [thread:$0]  %s104_s22, 16, %s213_s2, [#allocation3]  }
  0xf0   :  { %160 = dma.done.wait [#allocation3], 16  }
  0xf1   :  { %161 = vsyncadd [#allocation3], 4294967280 }
  0xf2   :  { %110 = vsyncpa [#allocation3], 1 }

</bundles_post_ra>
